<compile_context>
chip_gen: v5e
topology: v5e:2x2
jax: 0.10.0
libtpu: 0.0.40
codegen_flags: <defaults>
</compile_context>

<pallas_src>
import jax
import jax.numpy as jnp
from jax.experimental import pallas as pl
from jax.experimental.pallas import tpu as pltpu


def _se_kernel(x_ref, w1t_ref, w2t_ref, o_ref):
    # x_ref: (Bt, HW, C)  channels on lanes; w1t: (C, Cr); w2t: (Cr, C)

    # Squeeze: global average pool over the spatial (sublane) axis, f32 accum.
    pooled = jnp.mean(x_ref[...], axis=1, dtype=jnp.float32)        # (Bt, C)

    # Excitation: two bias-free linears as row-vector matmuls on the MXU.
    h = jnp.dot(pooled, w1t_ref[...].astype(jnp.float32),
                preferred_element_type=jnp.float32)                 # (Bt, Cr)
    h = jnp.maximum(h, 0.0)
    y = jnp.dot(h, w2t_ref[...].astype(jnp.float32),
                preferred_element_type=jnp.float32)                 # (Bt, C)
    y = jax.nn.sigmoid(y)                                           # (Bt, C)

    # Scale: re-read x from VMEM (cheap, keeps vreg pressure bounded) and
    # broadcast the per-image channel gains over the sublane/spatial axis.
    # Multiply in x's native dtype (bf16 stays bf16 on v6e/v7x).
    o_ref[...] = (x_ref[...] * y[:, None, :].astype(x_ref.dtype)).astype(o_ref.dtype)


def _choose_batch_tile(B, per_image_bytes, vmem_budget_per_block):
    """Largest divisor of B whose block fits the budget; keep >=2 grid steps
    when possible so the parallel batch axis can split across v7x's 2 TCs."""
    max_bt = max(1, vmem_budget_per_block // max(per_image_bytes, 1))
    if B >= 2:
        max_bt = min(max_bt, max(1, B // 2))
    bt = 1
    for d in range(1, B + 1):
        if B % d == 0 and d <= max_bt:
            bt = d
    return bt


def se_layer(x, w1, w2, *, vmem_budget_per_block=6 * 1024 * 1024):
    """x: (B, C, H, W); w1: (C//r, C); w2: (C, C//r) (nn.Linear (out,in))."""
    B, C, H, W = x.shape
    HW = H * W
    Cr = w1.shape[0]

    # Layout plumbing in the wrapper: channels-on-lanes slab for the kernel.
    x_nhwc = jnp.transpose(x, (0, 2, 3, 1)).reshape(B, HW, C)
    w1t = w1.T                       # (C, Cr)
    w2t = w2.T                       # (Cr, C)

    itemsize = jnp.dtype(x.dtype).itemsize
    per_image = C * HW * itemsize
    bt = _choose_batch_tile(B, per_image, vmem_budget_per_block)
    grid_b = B // bt

    # VMEM budget: in + out blocks, each double-buffered, plus weights + slack.
    w_bytes = 2 * 2 * C * Cr * jnp.dtype(w1.dtype).itemsize
    needed = 4 * bt * per_image + w_bytes
    vmem_limit = min(max(int(needed * 1.5), 16 * 1024 * 1024), 100 * 1024 * 1024)

    out_nhwc = pl.pallas_call(
        _se_kernel,
        out_shape=jax.ShapeDtypeStruct((B, HW, C), x.dtype),
        grid_spec=pltpu.PrefetchScalarGridSpec(
            num_scalar_prefetch=0,
            grid=(grid_b,),
            in_specs=[
                pl.BlockSpec((bt, HW, C), lambda b: (b, 0, 0)),
                pl.BlockSpec((C, Cr), lambda b: (0, 0)),
                pl.BlockSpec((Cr, C), lambda b: (0, 0)),
            ],
            out_specs=pl.BlockSpec((bt, HW, C), lambda b: (b, 0, 0)),
        ),
        compiler_params=pltpu.CompilerParams(
            dimension_semantics=("parallel",),
            vmem_limit_bytes=vmem_limit,
        ),
    )(x_nhwc, w1t, w2t)

    return jnp.transpose(out_nhwc.reshape(B, H, W, C), (0, 3, 1, 2))


def _reference(x, w1, w2):
    # Pure-JAX reference mirroring the PyTorch forward.
    y = jnp.mean(x, axis=(2, 3))                  # (B, C)
    y = jnp.maximum(y @ w1.T, 0.0)                # (B, C//r)
    y = jax.nn.sigmoid(y @ w2.T)                  # (B, C)
    return x * y[:, :, None, None]


if __name__ == "__main__":
    # SELayer(channel=64, reduction=16) -> hidden = 4
    B, C, H, W = 2, 64, 16, 16
    reduction = 16
    Cr = C // reduction

    key = jax.random.PRNGKey(0)
    kx, k1, k2 = jax.random.split(key, 3)

    x = jax.random.normal(kx, (B, C, H, W), dtype=jnp.float32)
    # Deterministic synthetic weights (shapes follow nn.Linear: (out, in)).
    w1 = jax.random.normal(k1, (Cr, C), dtype=jnp.float32) * (1.0 / jnp.sqrt(C))
    w2 = jax.random.normal(k2, (C, Cr), dtype=jnp.float32) * (1.0 / jnp.sqrt(Cr))

    out = se_layer(x, w1, w2)
    jax.block_until_ready(out)

    ref = _reference(x, w1, w2)
    assert jnp.allclose(out, ref, atol=1e-5, rtol=1e-5), "mismatch vs reference"

    print("KERNEL_OK")
</pallas_src>

<mosaic_0001>
module attributes {stable_mosaic.version = 11 : i64} {
  func.func @_se_kernel(%arg0: i32, %arg1: memref<1x256x64xf32, #tpu.memory_space<vmem>>, %arg2: memref<64x4xf32, #tpu.memory_space<vmem>>, %arg3: memref<4x64xf32, #tpu.memory_space<vmem>>, %arg4: memref<1x256x64xf32, #tpu.memory_space<vmem>>) attributes {dimension_semantics = [#tpu.dimension_semantics<parallel>], iteration_bounds = array<i64: 2>, scalar_prefetch = 0 : i64, scratch_operands = 0 : i64, tpu.core_type = #tpu.core_type<tc>, window_params = [{transform_indices = @transform_0, window_bounds = array<i64: 1, 256, 64>}, {pipeline_mode = #tpu.pipeline_mode<synchronous>, transform_indices = @transform_1, window_bounds = array<i64: 64, 4>}, {pipeline_mode = #tpu.pipeline_mode<synchronous>, transform_indices = @transform_2, window_bounds = array<i64: 4, 64>}, {transform_indices = @transform_3, window_bounds = array<i64: 1, 256, 64>}]} {
    %c0 = arith.constant 0 : index
    %c0_0 = arith.constant 0 : index
    %c0_1 = arith.constant 0 : index
    %0 = vector.load %arg1[%c0, %c0_0, %c0_1] : memref<1x256x64xf32, #tpu.memory_space<vmem>>, vector<1x256x64xf32>
    %cst = arith.constant dense<0.000000e+00> : vector<1x64xf32>
    %1 = vector.multi_reduction <add>, %0, %cst [1] : vector<1x256x64xf32> to vector<1x64xf32>
    %cst_2 = arith.constant 2.560000e+02 : f32
    %2 = vector.broadcast %cst_2 : f32 to vector<1x64xf32>
    %3 = arith.divf %1, %2 : vector<1x64xf32>
    %c0_3 = arith.constant 0 : index
    %c0_4 = arith.constant 0 : index
    %4 = vector.load %arg2[%c0_3, %c0_4] : memref<64x4xf32, #tpu.memory_space<vmem>>, vector<64x4xf32>
    %cst_5 = arith.constant dense<0.000000e+00> : vector<1x4xf32>
    %5 = tpu.matmul %3, %4, %cst_5 {dimension_numbers = #tpu.dot_dimension_numbers<[1], [0], [0], [1], [0, 0, 1, 1], [], []>} : vector<1x64xf32>, vector<64x4xf32>, vector<1x4xf32> -> vector<1x4xf32>
    %cst_6 = arith.constant 0.000000e+00 : f32
    %6 = vector.broadcast %cst_6 : f32 to vector<1x4xf32>
    %7 = arith.maximumf %5, %6 : vector<1x4xf32>
    %c0_7 = arith.constant 0 : index
    %c0_8 = arith.constant 0 : index
    %8 = vector.load %arg3[%c0_7, %c0_8] : memref<4x64xf32, #tpu.memory_space<vmem>>, vector<4x64xf32>
    %cst_9 = arith.constant dense<0.000000e+00> : vector<1x64xf32>
    %9 = tpu.matmul %7, %8, %cst_9 {dimension_numbers = #tpu.dot_dimension_numbers<[1], [0], [0], [1], [0, 0, 1, 1], [], []>} : vector<1x4xf32>, vector<4x64xf32>, vector<1x64xf32> -> vector<1x64xf32>
    %10 = arith.negf %9 : vector<1x64xf32>
    %11 = math.exp %10 : vector<1x64xf32>
    %cst_10 = arith.constant 1.000000e+00 : f32
    %12 = vector.broadcast %cst_10 : f32 to vector<1x64xf32>
    %13 = arith.addf %12, %11 : vector<1x64xf32>
    %14 = arith.divf %12, %13 : vector<1x64xf32>
    %c0_11 = arith.constant 0 : index
    %c0_12 = arith.constant 0 : index
    %c0_13 = arith.constant 0 : index
    %15 = vector.load %arg1[%c0_11, %c0_12, %c0_13] : memref<1x256x64xf32, #tpu.memory_space<vmem>>, vector<1x256x64xf32>
    %16 = vector.shape_cast %14 : vector<1x64xf32> to vector<1x1x64xf32>
    %17 = vector.broadcast %16 : vector<1x1x64xf32> to vector<1x256x64xf32>
    %18 = arith.mulf %15, %17 : vector<1x256x64xf32>
    %c0_14 = arith.constant 0 : index
    %c0_15 = arith.constant 0 : index
    %c0_16 = arith.constant 0 : index
    %19 = vector.load %arg4[%c0_14, %c0_15, %c0_16] : memref<1x256x64xf32, #tpu.memory_space<vmem>>, vector<1x256x64xf32>
    tpu.vector_store %arg4[%c0_14, %c0_15, %c0_16], %18 {strides = array<i32>} : memref<1x256x64xf32, #tpu.memory_space<vmem>>, vector<1x256x64xf32>,
    return
  }
  func.func @transform_0(%arg0: i32) -> (i32, i32, i32) {
    %c0_i32 = arith.constant 0 : i32
    %c0_i32_0 = arith.constant 0 : i32
    %c0_i32_1 = arith.constant 0 : i32
    return %arg0, %c0_i32, %c0_i32_0 : i32, i32, i32
  }
  func.func @transform_1(%arg0: i32) -> (i32, i32) {
    %c0_i32 = arith.constant 0 : i32
    %c0_i32_0 = arith.constant 0 : i32
    %c0_i32_1 = arith.constant 0 : i32
    return %c0_i32, %c0_i32_0 : i32, i32
  }
  func.func @transform_2(%arg0: i32) -> (i32, i32) {
    %c0_i32 = arith.constant 0 : i32
    %c0_i32_0 = arith.constant 0 : i32
    %c0_i32_1 = arith.constant 0 : i32
    return %c0_i32, %c0_i32_0 : i32, i32
  }
  func.func @transform_3(%arg0: i32) -> (i32, i32, i32) {
    %c0_i32 = arith.constant 0 : i32
    %c0_i32_0 = arith.constant 0 : i32
    %c0_i32_1 = arith.constant 0 : i32
    return %arg0, %c0_i32, %c0_i32_0 : i32, i32, i32
  }
}

</mosaic_0001>

<bundles_post_ra>
// kernel: tpu_custom_call.1
= control target key start
LH: loop header
LB: loop body
LE: loop exit
PB: predicated region body
PF: predicated region fallthrough
CT: control target
= control target key end

     0   :  { %s542_s12 = smov 0   ;;  %s854_s0 = inlined_call_operand.vmem [shape: f32[2,256,64], index: 0, kind: input, shape index: {}]   ;;  %s855_s1 = inlined_call_operand.vmem [shape: f32[64,4], index: 1, kind: input, shape index: {}]   ;;  %s856_s2 = inlined_call_operand.vmem [shape: f32[4,64], index: 2, kind: input, shape index: {}]   ;;  %s857_s3 = inlined_call_operand.vmem [shape: f32[2,256,64], index: 3, kind: output, shape index: {}]  }
   0x1 LB: > { %s481_s13 = sadd.s32 4294967295, %s519_s12   ;;  %p485_p0 = scmp.ge.s32.totalorder %s519_s12, 1  ;;  %s519_s12 = sphi %s542_s12, %s13_s12  }
   0x2   : > { %p137_p1 = scmp.lt.s32.totalorder %s519_s12, 3 }
   0x4   : > { %p138_p2 = pnand %p485_p0, %p137_p1 }
   0x5   : > { %p161_p3 = scmp.lt.s32.totalorder (!%p138_p2), %s481_s13, 1 }
   0x6   : > { %141 = sbr.rel (%p138_p2) target bundleno = 410 (0x19a), region = 32 }
   0xb   : > { %v288_v0 = vld [vmem:[%s855_s1 + $0x38] sm:$0xff]  ;;  %v287_v1 = vld [vmem:[%s855_s1 + $0x30] sm:$0xff]  ;;  %v286_v2 = vld [vmem:[%s855_s1 + $0x28] sm:$0xff]  ;;  %s859_s13 = smov (!%p161_p3, %s481_s13), 1  ;;  %vm203_vm0 = vcmask 523264   ;;  %vm318_vm2 = vcmask 1043456  }
   0xc   : > { %300 = vmatpush.msra.mxu0 %v288_v0  ;;  %v285_v3 = vld [vmem:[%s855_s1 + $0x20] sm:$0xff]  ;;  %s496_s22 = sshll.u32 %s859_s13, 8  ;;  %v284_v4 = vld [vmem:[%s855_s1 + $0x18] sm:$0xff]  ;;  %v283_v12 = vld [vmem:[%s855_s1 + $0x10] sm:$0xff]  ;;  %vm314_vm3 = vcmask 31744  }
   0xd   : > { %s573_s27 = scalar_lea.vmem %s854_s0, %s496_s22  ;;  %v282_v16 = vld [vmem:[%s855_s1 + $0x8] sm:$0xff]  ;;  %v281_v20 = vld [vmem:[%s855_s1] sm:$0xff]  ;;  %s753_s11 = scalar_lea.vmem %s857_s3, %s496_s22 }
   0xe   : > { %301 = vmatpush.msra.mxu0 %v287_v1  ;;  %v576_v5 = vld [vmem:[%s573_s27] sm:$0xff]  ;;  %v579_v6 = vld [vmem:[%s573_s27 + $0x8] sm:$0xff]  ;;  %v582_v7 = vld [vmem:[%s573_s27 + $0x10] sm:$0xff] }
   0xf   : > { %v585_v8 = vld [vmem:[%s573_s27 + $0x18] sm:$0xff]  ;;  %v204_v9 = vsel %vm203_vm0, %v576_v5, 0.0  ;;  %v205_v10 = vsel %vm203_vm0, %v579_v6, 0.0  ;;  %v207_v11 = vsel %vm203_vm0, %v582_v7, 0.0  ;;  %v597_v13 = vld [vmem:[%s573_s27 + $0x20] sm:$0xff]  ;;  %v605_v17 = vld [vmem:[%s573_s27 + $0x28] sm:$0xff] }
  0x10   : > { %302 = vmatpush.msra.mxu0 %v286_v2  ;;  %v206_v14 = vadd.f32 %v205_v10, %v204_v9  ;;  %v209_v15 = vsel %vm203_vm0, %v585_v8, 0.0  ;;  %v211_v19 = vsel %vm203_vm0, %v597_v13, 0.0  ;;  %v613_v21 = vld [vmem:[%s573_s27 + $0x30] sm:$0xff]  ;;  %v213_v23 = vsel %vm203_vm0, %v605_v17, 0.0  ;;  %v618_v24 = vld [vmem:[%s573_s27 + $0x38] sm:$0xff]  ;;  %v623_v27 = vld [vmem:[%s573_s27 + $0x40] sm:$0xff] }
  0x11   : > { %v215_v26 = vsel %vm203_vm0, %v613_v21, 0.0  ;;  %v217_v29 = vsel %vm203_vm0, %v618_v24, 0.0  ;;  %v628_v30 = vld [vmem:[%s573_s27 + $0x48] sm:$0xff]  ;;  %v219_v32 = vsel %vm203_vm0, %v623_v27, 0.0  ;;  %v633_v33 = vld [vmem:[%s573_s27 + $0x50] sm:$0xff]  ;;  %v638_v36 = vld [vmem:[%s573_s27 + $0x58] sm:$0xff] }
  0x12   : > { %303 = vmatpush.msra.mxu0 %v285_v3  ;;  %v208_v18 = vadd.f32 %v207_v11, %v206_v14  ;;  %v221_v35 = vsel %vm203_vm0, %v628_v30, 0.0  ;;  %v223_v38 = vsel %vm203_vm0, %v633_v33, 0.0  ;;  %v643_v39 = vld [vmem:[%s573_s27 + $0x60] sm:$0xff]  ;;  %v225_v41 = vsel %vm203_vm0, %v638_v36, 0.0  ;;  %v648_v42 = vld [vmem:[%s573_s27 + $0x68] sm:$0xff]  ;;  %v653_v45 = vld [vmem:[%s573_s27 + $0x70] sm:$0xff] }
  0x13   : > { %v227_v44 = vsel %vm203_vm0, %v643_v39, 0.0  ;;  %v229_v47 = vsel %vm203_vm0, %v648_v42, 0.0  ;;  %v658_v48 = vld [vmem:[%s573_s27 + $0x78] sm:$0xff]  ;;  %v231_v50 = vsel %vm203_vm0, %v653_v45, 0.0  ;;  %v663_v51 = vld [vmem:[%s573_s27 + $0x80] sm:$0xff]  ;;  %v668_v54 = vld [vmem:[%s573_s27 + $0x88] sm:$0xff] }
  0x14   : > { %304 = vmatpush.msra.mxu0 %v284_v4  ;;  %v210_v22 = vadd.f32 %v209_v15, %v208_v18  ;;  %v233_v53 = vsel %vm203_vm0, %v658_v48, 0.0  ;;  %v235_v56 = vsel %vm203_vm0, %v663_v51, 0.0  ;;  %v673_v57 = vld [vmem:[%s573_s27 + $0x90] sm:$0xff]  ;;  %v237_v59 = vsel %vm203_vm0, %v668_v54, 0.0  ;;  %v678_v60 = vld [vmem:[%s573_s27 + $0x98] sm:$0xff]  ;;  %v683_v63 = vld [vmem:[%s573_s27 + $0xa0] sm:$0xff] }
  0x15   : > { %v239_v62 = vsel %vm203_vm0, %v673_v57, 0.0  ;;  %v241_v1 = vsel %vm203_vm0, %v678_v60, 0.0  ;;  %v688_v2 = vld [vmem:[%s573_s27 + $0xa8] sm:$0xff]  ;;  %v243_v4 = vsel %vm203_vm0, %v683_v63, 0.0  ;;  %v693_v9 = vld [vmem:[%s573_s27 + $0xb0] sm:$0xff] }
  0x16   : > { %305 = vmatpush.msra.mxu0 %v283_v12  ;;  %v212_v25 = vadd.f32 %v211_v19, %v210_v22  ;;  %v245_v11 = vsel %vm203_vm0, %v688_v2, 0.0  ;;  %v698_v12 = vld [vmem:[%s573_s27 + $0xb8] sm:$0xff]  ;;  %v247_v15 = vsel %vm203_vm0, %v693_v9, 0.0 }
  0x17   : > { %v249_v19 = vsel %vm203_vm0, %v698_v12, 0.0 }
  0x18   : > { %306 = vmatpush.msra.mxu0 %v282_v16  ;;  %v214_v28 = vadd.f32 %v213_v23, %v212_v25  ;;  %v703_v16 = vld [vmem:[%s573_s27 + $0xc0] sm:$0xff]  ;;  %v713_v25 = vld [vmem:[%s573_s27 + $0xd0] sm:$0xff] }
  0x19   : > { %v251_v23 = vsel %vm203_vm0, %v703_v16, 0.0 }
  0x1a   : > { %307 = vmatpush.msra.mxu0 %v281_v20  ;;  %v216_v31 = vadd.f32 %v215_v26, %v214_v28  ;;  %v708_v20 = vld [vmem:[%s573_s27 + $0xc8] sm:$0xff] }
  0x1b   : > { %v253_v28 = vsel %vm203_vm0, %v708_v20, 0.0 }
  0x1c   : > { %v218_v34 = vadd.f32 %v217_v29, %v216_v31  ;;  %v718_v29 = vld [vmem:[%s573_s27 + $0xd8] sm:$0xff] }
  0x1e   : > { %v220_v37 = vadd.f32 %v219_v32, %v218_v34  ;;  %v521_v32 = vmov 256.0   ;;  %v255_v34 = vsel %vm203_vm0, %v713_v25, 0.0 }
  0x1f   : > { %507 = vrcp.f32 %v521_v32 }
  0x20   : > { %v222_v40 = vadd.f32 %v221_v35, %v220_v37  ;;  %v723_v35 = vld [vmem:[%s573_s27 + $0xe0] sm:$0xff] }
  0x22   : > { %v224_v43 = vadd.f32 %v223_v38, %v222_v40  ;;  %v257_v38 = vsel %vm203_vm0, %v718_v29, 0.0  ;;  %v728_v40 = vld [vmem:[%s573_s27 + $0xe8] sm:$0xff] }
  0x24   : > { %v226_v46 = vadd.f32 %v225_v41, %v224_v43  ;;  %v259_v43 = vsel %vm203_vm0, %v723_v35, 0.0 }
  0x26   : > { %v228_v49 = vadd.f32 %v227_v44, %v226_v46  ;;  %v508_v44 = vpop.eup %507  ;;  %v733_v46 = vld [vmem:[%s573_s27 + $0xf0] sm:$0xff] }
  0x27   : > { %vm278_vm1 = vweird.f32 %v508_v44 }
  0x28   : > { %v230_v52 = vadd.f32 %v229_v47, %v228_v49  ;;  %v261_v49 = vsel %vm203_vm0, %v728_v40, 0.0 }
  0x2a   : > { %v232_v55 = vadd.f32 %v231_v50, %v230_v52  ;;  %v738_v50 = vld [vmem:[%s573_s27 + $0xf8] sm:$0xff] }
  0x2c   : > { %v234_v58 = vadd.f32 %v233_v53, %v232_v55  ;;  %v263_v53 = vsel %vm203_vm0, %v733_v46, 0.0  ;;  %v274_v55 = vmul.f32 256.0, %v508_v44 }
  0x2e   : > { %v236_v61 = vadd.f32 %v235_v56, %v234_v58  ;;  %v265_v58 = vsel %vm203_vm0, %v738_v50, 0.0 }
  0x30   : > { %v238_v0 = vadd.f32 %v237_v59, %v236_v61  ;;  %v275_v61 = vsub.f32 1.0, %v274_v55 }
  0x32   : > { %v240_v3 = vadd.f32 %v239_v62, %v238_v0 }
  0x34   : > { %v242_v10 = vadd.f32 %v241_v1, %v240_v3  ;;  %v276_v1 = vmul.f32 %v508_v44, %v275_v61 }
  0x36   : > { %v244_v14 = vadd.f32 %v243_v4, %v242_v10  ;;  %v277_v10 = vadd.f32 %v508_v44, %v276_v1 }
  0x38   : > { %v246_v18 = vadd.f32 %v245_v11, %v244_v14 }
  0x3a   : > { %v248_v22 = vadd.f32 %v247_v15, %v246_v18  ;;  %v279_v15 = vsel %vm278_vm1, %v508_v44, %v277_v10 }
  0x3c   : > { %v250_v26 = vadd.f32 %v249_v19, %v248_v22  ;;  %v313_v22 = vld [vmem:[%s856_s2] sm:$0xf] }
  0x3d   : > { %491 = vmatpush.msk.msra.mxu1 %vm318_vm2, %v313_v22 }
  0x3e   : > { %v252_v31 = vadd.f32 %v251_v23, %v250_v26 }
  0x40   : > { %v254_v37 = vadd.f32 %v253_v28, %v252_v31 }
  0x42   : > { %v256_v41 = vadd.f32 %v255_v34, %v254_v37 }
  0x44   : > { %v258_v47 = vadd.f32 %v257_v38, %v256_v41 }
  0x46   : > { %v260_v52 = vadd.f32 %v259_v43, %v258_v47 }
  0x48   : > { %v262_v56 = vadd.f32 %v261_v49, %v260_v52 }
  0x4a   : > { %v264_v59 = vadd.f32 %v263_v53, %v262_v56 }
  0x4c   : > { %v266_v62 = vadd.f32 %v265_v58, %v264_v59 }
  0x4e   : > { %v267_v0 = vrot.slane %v266_v62, 4 }
  0x50   : > { %v268_v3 = vadd.f32 %v267_v0, %v266_v62 }
  0x52   : > { %v269_v4 = vrot.slane %v268_v3, 2 }
  0x54   : > { %v270_v11 = vadd.f32 %v269_v4, %v268_v3 }
  0x56   : > { %v271_v14 = vrot.slane %v270_v11, 1 }
  0x58   : > { %v272_v18 = vadd.f32 %v271_v14, %v270_v11 }
  0x5a   : > { %v280_v19 = vmul.f32 %v279_v15, %v272_v18 }
  0x5c   : > { %490 = vmatmul.msk.f32.vlgmr.msra.gmra.mxu0 %vm203_vm0, %v280_v19 }
  0xd9   : > { %v309_v23 = vpop.f32.mrf.mxu0 }
  0xda   : > { %v312_v26 = vmax.f32 %v309_v23, 0.0 }
  0xdc   : > { %492 = vmatmul.msk.f32.vlgmr.msra.gmra.mxu1 %vm314_vm3, %v312_v26 }
 0x159   : > { %v339_v28 = vpop.f32.mrf.mxu1 }
 0x15a   : > { %v493_v31 = vmul.f32 -1.442695, %v339_v28 }
 0x15c   : > { %509 = vpow2.f32 %v493_v31 }
 0x162   : > { %v510_v32 = vpop.eup %509 }
 0x163   : > { %v345_v34 = vadd.f32 1.0, %v510_v32 }
 0x165   : > { %511 = vrcp.f32 %v345_v34  ;;  %v357_v43 = vand.u32 2147483648, %v345_v34  ;;  %v355_v47 = vand.u32 2147483647, %v345_v34  ;;  %vm351_vm5 = vweird.f32 %v345_v34 }
 0x167   : > { %v358_v52 = vor.u32 1.1754944e-38, %v357_v43  ;;  %vm356_vm7 = vcmp.eq.f32.partialorder %v355_v47, 8.507059e+37 }
 0x16b   : > { %v512_v37 = vpop.eup %511 }
 0x16c   : > { %v347_v38 = vmul.f32 %v512_v37, %v345_v34  ;;  %vm352_vm4 = vweird.f32 %v512_v37 }
 0x16d   : > { %vm353_vm6 = vmor %vm351_vm5, %vm352_vm4 }
 0x16e   : > { %v348_v41 = vsub.f32 1.0, %v347_v38 }
 0x170   : > { %v349_v44 = vmul.f32 %v512_v37, %v348_v41 }
 0x172   : > { %v350_v49 = vadd.f32 %v512_v37, %v349_v44 }
 0x174   : > { %v354_v53 = vsel %vm353_vm6, %v512_v37, %v350_v49 }
 0x175   : > { %v359_v55 = vsel %vm356_vm7, %v358_v52, %v354_v53 }
 0x176   : > { %v361_v56 = vperm.slane %v359_v55, 0 }
 0x178   : > { %v362_v58 = vmul.f32 %v361_v56, %v576_v5  ;;  %v363_v59 = vmul.f32 %v361_v56, %v579_v6  ;;  %v364_v61 = vmul.f32 %v361_v56, %v582_v7  ;;  %v365_v62 = vmul.f32 %v361_v56, %v585_v8 }
 0x179   : > { %v366_v0 = vmul.f32 %v361_v56, %v597_v13  ;;  %v367_v1 = vmul.f32 %v361_v56, %v605_v17  ;;  %v368_v5 = vmul.f32 %v361_v56, %v613_v21  ;;  %v369_v6 = vmul.f32 %v361_v56, %v618_v24 }
 0x17a   : > { %394 = vst.msk [vmem:[%s753_s11] sm:$0xff] %vm203_vm0, %v362_v58  ;;  %v370_v7 = vmul.f32 %v361_v56, %v623_v27  ;;  %v371_v8 = vmul.f32 %v361_v56, %v628_v30  ;;  %v372_v13 = vmul.f32 %v361_v56, %v633_v33  ;;  %v373_v17 = vmul.f32 %v361_v56, %v638_v36 }
 0x17b   : > { %395 = vst.msk [vmem:[%s753_s11 + $0x8] sm:$0xff] %vm203_vm0, %v363_v59  ;;  %v374_v21 = vmul.f32 %v361_v56, %v643_v39  ;;  %v375_v24 = vmul.f32 %v361_v56, %v648_v42  ;;  %v376_v27 = vmul.f32 %v361_v56, %v653_v45  ;;  %v377_v30 = vmul.f32 %v361_v56, %v658_v48 }
 0x17c   : > { %396 = vst.msk [vmem:[%s753_s11 + $0x10] sm:$0xff] %vm203_vm0, %v364_v61  ;;  %v378_v33 = vmul.f32 %v361_v56, %v663_v51  ;;  %v379_v36 = vmul.f32 %v361_v56, %v668_v54  ;;  %v380_v39 = vmul.f32 %v361_v56, %v673_v57  ;;  %v381_v42 = vmul.f32 %v361_v56, %v678_v60 }
 0x17d   : > { %397 = vst.msk [vmem:[%s753_s11 + $0x18] sm:$0xff] %vm203_vm0, %v365_v62  ;;  %v382_v45 = vmul.f32 %v361_v56, %v683_v63  ;;  %v383_v48 = vmul.f32 %v361_v56, %v688_v2  ;;  %v384_v51 = vmul.f32 %v361_v56, %v693_v9  ;;  %v385_v54 = vmul.f32 %v361_v56, %v698_v12 }
 0x17e   : > { %398 = vst.msk [vmem:[%s753_s11 + $0x20] sm:$0xff] %vm203_vm0, %v366_v0  ;;  %v386_v57 = vmul.f32 %v361_v56, %v703_v16  ;;  %v387_v60 = vmul.f32 %v361_v56, %v708_v20  ;;  %v388_v63 = vmul.f32 %v361_v56, %v713_v25  ;;  %v389_v2 = vmul.f32 %v361_v56, %v718_v29 }
 0x17f   : > { %399 = vst.msk [vmem:[%s753_s11 + $0x28] sm:$0xff] %vm203_vm0, %v367_v1  ;;  %v390_v9 = vmul.f32 %v361_v56, %v723_v35  ;;  %v391_v12 = vmul.f32 %v361_v56, %v728_v40  ;;  %v392_v16 = vmul.f32 %v361_v56, %v733_v46  ;;  %v393_v20 = vmul.f32 %v361_v56, %v738_v50 }
 0x180   : > { %400 = vst.msk [vmem:[%s753_s11 + $0x30] sm:$0xff] %vm203_vm0, %v368_v5 }
 0x181   : > { %401 = vst.msk [vmem:[%s753_s11 + $0x38] sm:$0xff] %vm203_vm0, %v369_v6 }
 0x182   : > { %402 = vst.msk [vmem:[%s753_s11 + $0x40] sm:$0xff] %vm203_vm0, %v370_v7 }
 0x183   : > { %403 = vst.msk [vmem:[%s753_s11 + $0x48] sm:$0xff] %vm203_vm0, %v371_v8 }
 0x184   : > { %404 = vst.msk [vmem:[%s753_s11 + $0x50] sm:$0xff] %vm203_vm0, %v372_v13 }
 0x185   : > { %405 = vst.msk [vmem:[%s753_s11 + $0x58] sm:$0xff] %vm203_vm0, %v373_v17 }
 0x186   : > { %406 = vst.msk [vmem:[%s753_s11 + $0x60] sm:$0xff] %vm203_vm0, %v374_v21 }
 0x187   : > { %407 = vst.msk [vmem:[%s753_s11 + $0x68] sm:$0xff] %vm203_vm0, %v375_v24 }
 0x188   : > { %408 = vst.msk [vmem:[%s753_s11 + $0x70] sm:$0xff] %vm203_vm0, %v376_v27 }
 0x189   : > { %409 = vst.msk [vmem:[%s753_s11 + $0x78] sm:$0xff] %vm203_vm0, %v377_v30 }
 0x18a   : > { %410 = vst.msk [vmem:[%s753_s11 + $0x80] sm:$0xff] %vm203_vm0, %v378_v33 }
 0x18b   : > { %411 = vst.msk [vmem:[%s753_s11 + $0x88] sm:$0xff] %vm203_vm0, %v379_v36 }
 0x18c   : > { %412 = vst.msk [vmem:[%s753_s11 + $0x90] sm:$0xff] %vm203_vm0, %v380_v39 }
 0x18d   : > { %413 = vst.msk [vmem:[%s753_s11 + $0x98] sm:$0xff] %vm203_vm0, %v381_v42 }
 0x18e   : > { %414 = vst.msk [vmem:[%s753_s11 + $0xa0] sm:$0xff] %vm203_vm0, %v382_v45 }
 0x18f   : > { %415 = vst.msk [vmem:[%s753_s11 + $0xa8] sm:$0xff] %vm203_vm0, %v383_v48 }
 0x190   : > { %416 = vst.msk [vmem:[%s753_s11 + $0xb0] sm:$0xff] %vm203_vm0, %v384_v51 }
 0x191   : > { %417 = vst.msk [vmem:[%s753_s11 + $0xb8] sm:$0xff] %vm203_vm0, %v385_v54 }
 0x192   : > { %418 = vst.msk [vmem:[%s753_s11 + $0xc0] sm:$0xff] %vm203_vm0, %v386_v57 }
 0x193   : > { %419 = vst.msk [vmem:[%s753_s11 + $0xc8] sm:$0xff] %vm203_vm0, %v387_v60 }
 0x194   : > { %420 = vst.msk [vmem:[%s753_s11 + $0xd0] sm:$0xff] %vm203_vm0, %v388_v63 }
 0x195   : > { %421 = vst.msk [vmem:[%s753_s11 + $0xd8] sm:$0xff] %vm203_vm0, %v389_v2 }
 0x196   : > { %422 = vst.msk [vmem:[%s753_s11 + $0xe0] sm:$0xff] %vm203_vm0, %v390_v9 }
 0x197   : > { %423 = vst.msk [vmem:[%s753_s11 + $0xe8] sm:$0xff] %vm203_vm0, %v391_v12 }
 0x198   : > { %424 = vst.msk [vmem:[%s753_s11 + $0xf0] sm:$0xff] %vm203_vm0, %v392_v16 }
 0x199   : > { %425 = vst.msk [vmem:[%s753_s11 + $0xf8] sm:$0xff] %vm203_vm0, %v393_v20 }
 0x19a PF: > { %s13_s12 = sadd.s32 1, %s519_s12  }
 0x19b   : > { %p10_p4 = scmp.ge.s32.totalorder %s13_s12, 4  }
 0x19d   :  { %12 = sbr.rel (!%p10_p4) target bundleno = 1 (0x1), region = 62 }

</bundles_post_ra>
